<compile_context>
chip_gen: v7x
topology: tpu7x:2x2x1
jax: 0.10.0
libtpu: 0.0.40
codegen_flags: <defaults>
</compile_context>

<pallas_src>
import functools

import jax
import jax.numpy as jnp
from jax import lax
from jax.experimental import pallas as pl
from jax.experimental.pallas import tpu as pltpu

_LANE = 128
_SUB = 8


def _round_up(x, m):
    return ((x + m - 1) // m) * m


def _fused_head_kernel(seq_ref, emb_ref, w1_ref, b1_ref, w2_ref, b2_ref,
                       w3_ref, b3_ref, out_ref, pooled_ref, acc_ref,
                       *, seq_len, ts, v_pad):
    """One (batch_tile, seq_tile) grid step.

    seq_ref:  [TB, TS] int32 token ids (padding = -1, never matches a vocab id)
    emb_ref:  [V_pad, D_pad] bf16 embedding table (grid-invariant, VMEM resident)
    w*/b*:    bf16 weights / f32 biases of the MLP head (grid-invariant)
    acc_ref:  [TB, D_pad] f32 running pooled sum (scratch, persists across seq steps)
    """
    s_idx = pl.program_id(1)
    ns = pl.num_programs(1)

    @pl.when(s_idx == 0)
    def _init():
        acc_ref[...] = jnp.zeros_like(acc_ref)

    ids = seq_ref[...]                                     # [TB, TS] int32
    tb = ids.shape[0]

    # ---- gather + pool as an MXU matmul ------------------------------------
    # counts[b, v] = number of tokens in this tile equal to vocab id v.
    # Loop over the (short) seq axis, fully unrolled (static Python loop); compares
    # stay int32/f32 on the VPU (no bf16 elementwise -> v5e-safe), no XLU reduce.
    vocab_iota = lax.broadcasted_iota(jnp.int32, (tb, v_pad), 1)
    counts = jnp.zeros((tb, v_pad), jnp.float32)
    for s in range(ts):                                    # ts is static -> fully unrolled
        tok = ids[:, s:s + 1]                              # [TB, 1] static lane slice
        counts = counts + (tok == vocab_iota).astype(jnp.float32)

    # counts <= TS <= 128 are exact in bf16; a single bf16 MXU matmul replaces the
    # per-vocab FMA accumulation of the previous version.
    acc_ref[...] += jnp.dot(counts.astype(jnp.bfloat16), emb_ref[...],
                            preferred_element_type=jnp.float32)

    # ---- finalize: mean + 3-layer MLP head on the MXU ----------------------
    @pl.when(s_idx == ns - 1)
    def _finalize():
        pooled = acc_ref[...] * (1.0 / float(seq_len))     # mean over the real seq length
        pooled_ref[...] = pooled.astype(pooled_ref.dtype)  # returned embedding stays f32
        x = jnp.dot(pooled.astype(jnp.bfloat16), w1_ref[...],
                    preferred_element_type=jnp.float32)
        x = jnp.maximum(x + b1_ref[...], 0.0)
        x = jnp.dot(x.astype(jnp.bfloat16), w2_ref[...],
                    preferred_element_type=jnp.float32)
        x = jnp.maximum(x + b2_ref[...], 0.0)
        x = jnp.dot(x.astype(jnp.bfloat16), w3_ref[...],
                    preferred_element_type=jnp.float32)
        out_ref[...] = (x + b3_ref[...]).astype(out_ref.dtype)


def fused_finetuning_head(seq_p, emb_p, w1, b1, w2, b2, w3, b3,
                          *, seq_len, tb, ts):
    """Fused embed-gather + mean-pool + fc1/relu/fc2/relu/fc3 head."""
    B_pad, S_pad = seq_p.shape
    V_pad, D_pad = emb_p.shape
    H_pad = w1.shape[1]
    C_pad = w3.shape[1]
    nb = B_pad // tb
    ns = S_pad // ts

    kernel = functools.partial(_fused_head_kernel,
                               seq_len=seq_len, ts=ts, v_pad=V_pad)

    def invariant(shape):
        # Grid-invariant operand kept resident in VMEM.
        # TODO(synk): for a realistic tGPT vocab (e.g. 50k x 768 bf16 ~ 73 MiB) the table
        # no longer fits v7x's 64 MiB VMEM; move it to memory_space=pl.ANY and DMA only
        # the touched vocab pages (or shard the counts@table contraction over a grid axis).
        return pl.BlockSpec(shape, lambda b, s: tuple(0 for _ in shape))

    return pl.pallas_call(
        kernel,
        out_shape=(
            jax.ShapeDtypeStruct((B_pad, C_pad), jnp.float32),   # padded logits
            jax.ShapeDtypeStruct((B_pad, D_pad), jnp.float32),   # padded pooled embedding
        ),
        grid_spec=pltpu.PrefetchScalarGridSpec(
            num_scalar_prefetch=0,
            grid=(nb, ns),                                        # reduction (seq) axis last
            in_specs=[
                pl.BlockSpec((tb, ts), lambda b, s: (b, s)),      # token ids, pipelined
                invariant((V_pad, D_pad)),                        # embed table (resident)
                invariant((D_pad, H_pad)), invariant((1, H_pad)),
                invariant((H_pad, H_pad)), invariant((1, H_pad)),
                invariant((H_pad, C_pad)), invariant((1, C_pad)),
            ],
            out_specs=[
                pl.BlockSpec((tb, C_pad), lambda b, s: (b, 0)),
                pl.BlockSpec((tb, D_pad), lambda b, s: (b, 0)),
            ],
            scratch_shapes=[pltpu.VMEM((tb, D_pad), jnp.float32)],
        ),
        compiler_params=pltpu.CompilerParams(
            dimension_semantics=("parallel", "arbitrary"),
            vmem_limit_bytes=32 * 1024 * 1024,
        ),
    )(seq_p, emb_p, w1, b1, w2, b2, w3, b3)


def _choose_tiles(B, S):
    """Size tiles to the real problem instead of always 128x128."""
    b8 = _round_up(B, 8)
    if b8 <= 8:
        tb = 8                                     # nothing meaningful to split
    else:
        # keep >= 2 batch blocks so v7x's two TensorCores both get work
        # (extra grid steps are ~free on single-TC v5e/v6e).
        tb = min(128, _round_up((b8 + 1) // 2, 8))
    b_pad = _round_up(B, tb)
    if S <= 128:
        ts, s_pad = S, S                           # full-dim block: exempt from lane rule
    else:
        ts, s_pad = 128, _round_up(S, 128)
    return tb, b_pad, ts, s_pad


def _linear_init(key, fan_in, fan_out, fan_in_pad, fan_out_pad):
    """PyTorch-style nn.Linear init; bf16 weights (MXU-native), f32 biases, zero-padded."""
    kw, kb = jax.random.split(key)
    bound = float(fan_in) ** -0.5
    w = jax.random.uniform(kw, (fan_in, fan_out), jnp.float32, -bound, bound)
    b = jax.random.uniform(kb, (fan_out,), jnp.float32, -bound, bound)
    w_p = (jnp.zeros((fan_in_pad, fan_out_pad), jnp.bfloat16)
           .at[:fan_in, :fan_out].set(w.astype(jnp.bfloat16)))
    b_p = jnp.zeros((1, fan_out_pad), jnp.float32).at[0, :fan_out].set(b)
    return w_p, b_p


class FinetuningModelPallas:

    def __init__(self, key, vocab_size=64, input_size=128, hidden_size=64,
                 num_classes=2):
        self.vocab_size = vocab_size
        self.input_size = input_size
        self.hidden_size = hidden_size
        self.num_classes = num_classes
        self.d_pad = _round_up(input_size, _LANE)
        self.h_pad = _round_up(hidden_size, _LANE)
        self.c_pad = _round_up(num_classes, _LANE)
        self.v_pad = _round_up(vocab_size, _LANE)   # lane-dense counts / clean MXU K dim

        k_emb, k1, k2, k3 = jax.random.split(key, 4)
        # TODO(synk): replace with the real tGPT (+ LoRA) backbone if weights were available.
        emb = jax.random.normal(k_emb, (vocab_size, input_size), jnp.float32) * 0.02
        self.embed_pad = (jnp.zeros((self.v_pad, self.d_pad), jnp.bfloat16)
                          .at[:vocab_size, :input_size].set(emb.astype(jnp.bfloat16)))
        self.w1, self.b1 = _linear_init(k1, input_size, hidden_size, self.d_pad, self.h_pad)
        self.w2, self.b2 = _linear_init(k2, hidden_size, hidden_size, self.h_pad, self.h_pad)
        self.w3, self.b3 = _linear_init(k3, hidden_size, num_classes, self.h_pad, self.c_pad)

    def __call__(self, seq):
        seq = seq.astype(jnp.int32)                 # seq.long() in the torch module
        B, S = seq.shape
        tb, b_pad, ts, s_pad = _choose_tiles(B, S)
        # pad ids with -1: never matches a vocab id, so padded rows/tokens contribute 0.
        seq_p = jnp.full((b_pad, s_pad), -1, jnp.int32).at[:B, :S].set(seq)
        logits_p, pooled_p = fused_finetuning_head(
            seq_p, self.embed_pad, self.w1, self.b1, self.w2, self.b2,
            self.w3, self.b3, seq_len=S, tb=tb, ts=ts)
        return logits_p[:B, :self.num_classes], pooled_p[:B, :self.input_size]


if __name__ == "__main__":
    key = jax.random.PRNGKey(0)
    k_model, k_seq = jax.random.split(key)

    B, S = 2, 8
    VOCAB, D_IN, H, C = 64, 128, 64, 2

    model = FinetuningModelPallas(k_model, vocab_size=VOCAB, input_size=D_IN,
                                  hidden_size=H, num_classes=C)
    seq = jax.random.randint(k_seq, (B, S), 0, VOCAB, dtype=jnp.int32)

    logits, pooled = model(seq)
    jax.block_until_ready((logits, pooled))

    # pure-JAX reference of the same math (bf16 table / bf16 MXU inputs, f32 accumulation)
    emb_f32 = model.embed_pad[:VOCAB, :D_IN].astype(jnp.float32)
    ebd_ref = jnp.take(emb_f32, seq, axis=0)
    pooled_ref = jnp.mean(ebd_ref, axis=1)
    w1, b1 = model.w1[:D_IN, :H], model.b1[:, :H]
    w2, b2 = model.w2[:H, :H], model.b2[:, :H]
    w3, b3 = model.w3[:H, :C], model.b3[:, :C]
    x_ref = jnp.maximum(
        jnp.dot(pooled_ref.astype(jnp.bfloat16), w1, preferred_element_type=jnp.float32) + b1, 0.0)
    x_ref = jnp.maximum(
        jnp.dot(x_ref.astype(jnp.bfloat16), w2, preferred_element_type=jnp.float32) + b2, 0.0)
    x_ref = jnp.dot(x_ref.astype(jnp.bfloat16), w3, preferred_element_type=jnp.float32) + b3

    assert logits.shape == (B, C) and pooled.shape == (B, D_IN)
    assert jnp.allclose(pooled, pooled_ref, atol=1e-5, rtol=1e-5), \
        float(jnp.max(jnp.abs(pooled - pooled_ref)))
    assert jnp.allclose(logits, x_ref, atol=1e-3, rtol=1e-3), \
        float(jnp.max(jnp.abs(logits - x_ref)))

    print("KERNEL_OK")
</pallas_src>

<mosaic_0001>
module attributes {stable_mosaic.version = 11 : i64} {
  func.func @_fused_head_kernel(%arg0: i32, %arg1: i32, %arg2: memref<8x8xi32, #tpu.memory_space<vmem>>, %arg3: memref<128x128xbf16, #tpu.memory_space<vmem>>, %arg4: memref<128x128xbf16, #tpu.memory_space<vmem>>, %arg5: memref<1x128xf32, #tpu.memory_space<vmem>>, %arg6: memref<128x128xbf16, #tpu.memory_space<vmem>>, %arg7: memref<1x128xf32, #tpu.memory_space<vmem>>, %arg8: memref<128x128xbf16, #tpu.memory_space<vmem>>, %arg9: memref<1x128xf32, #tpu.memory_space<vmem>>, %arg10: memref<8x128xf32, #tpu.memory_space<vmem>>, %arg11: memref<8x128xf32, #tpu.memory_space<vmem>>, %arg12: memref<8x128xf32, #tpu.memory_space<vmem>>) attributes {dimension_semantics = [#tpu.dimension_semantics<parallel>, #tpu.dimension_semantics<arbitrary>], iteration_bounds = array<i64: 1, 1>, scalar_prefetch = 0 : i64, scratch_operands = 1 : i64, tpu.core_type = #tpu.core_type<tc>, window_params = [{transform_indices = @transform_0, window_bounds = array<i64: 8, 8>}, {pipeline_mode = #tpu.pipeline_mode<synchronous>, transform_indices = @transform_1, window_bounds = array<i64: 128, 128>}, {pipeline_mode = #tpu.pipeline_mode<synchronous>, transform_indices = @transform_2, window_bounds = array<i64: 128, 128>}, {pipeline_mode = #tpu.pipeline_mode<synchronous>, transform_indices = @transform_3, window_bounds = array<i64: 1, 128>}, {pipeline_mode = #tpu.pipeline_mode<synchronous>, transform_indices = @transform_4, window_bounds = array<i64: 128, 128>}, {pipeline_mode = #tpu.pipeline_mode<synchronous>, transform_indices = @transform_5, window_bounds = array<i64: 1, 128>}, {pipeline_mode = #tpu.pipeline_mode<synchronous>, transform_indices = @transform_6, window_bounds = array<i64: 128, 128>}, {pipeline_mode = #tpu.pipeline_mode<synchronous>, transform_indices = @transform_7, window_bounds = array<i64: 1, 128>}, {transform_indices = @transform_8, window_bounds = array<i64: 8, 128>}, {transform_indices = @transform_9, window_bounds = array<i64: 8, 128>}]} {
    %c0_i32 = arith.constant 0 : i32
    %0 = arith.cmpi eq, %arg1, %c0_i32 : i32
    %1 = arith.extui %0 : i1 to i32
    %c0_i32_0 = arith.constant 0 : i32
    %2 = arith.cmpi ne, %1, %c0_i32_0 : i32
    scf.if %2 {
      %cst_11 = arith.constant 0.000000e+00 : f32
      %63 = vector.broadcast %cst_11 : f32 to vector<8x128xf32>
      %c0_12 = arith.constant 0 : index
      %c0_13 = arith.constant 0 : index
      %64 = vector.load %arg12[%c0_12, %c0_13] : memref<8x128xf32, #tpu.memory_space<vmem>>, vector<8x128xf32>
      tpu.vector_store %arg12[%c0_12, %c0_13], %63 {strides = array<i32>} : memref<8x128xf32, #tpu.memory_space<vmem>>, vector<8x128xf32>,
    } else {
    }
    %c0 = arith.constant 0 : index
    %c0_1 = arith.constant 0 : index
    %3 = vector.load %arg2[%c0, %c0_1] : memref<8x8xi32, #tpu.memory_space<vmem>>, vector<8x8xi32>
    %4 = tpu.iota {dimensions = array<i32: 1>} : vector<8x128xi32>
    %cst = arith.constant 0.000000e+00 : f32
    %5 = vector.broadcast %cst : f32 to vector<8x128xf32>
    %6 = vector.extract_strided_slice %3 {offsets = [0, 0], sizes = [8, 1], strides = [1, 1]} : vector<8x8xi32> to vector<8x1xi32>
    %7 = vector.broadcast %6 : vector<8x1xi32> to vector<8x128xi32>
    %8 = arith.cmpi eq, %7, %4 : vector<8x128xi32>
    %9 = arith.extui %8 : vector<8x128xi1> to vector<8x128xi32>
    %10 = arith.sitofp %9 : vector<8x128xi32> to vector<8x128xf32>
    %11 = arith.addf %5, %10 : vector<8x128xf32>
    %12 = vector.extract_strided_slice %3 {offsets = [0, 1], sizes = [8, 1], strides = [1, 1]} : vector<8x8xi32> to vector<8x1xi32>
    %13 = vector.broadcast %12 : vector<8x1xi32> to vector<8x128xi32>
    %14 = arith.cmpi eq, %13, %4 : vector<8x128xi32>
    %15 = arith.extui %14 : vector<8x128xi1> to vector<8x128xi32>
    %16 = arith.sitofp %15 : vector<8x128xi32> to vector<8x128xf32>
    %17 = arith.addf %11, %16 : vector<8x128xf32>
    %18 = vector.extract_strided_slice %3 {offsets = [0, 2], sizes = [8, 1], strides = [1, 1]} : vector<8x8xi32> to vector<8x1xi32>
    %19 = vector.broadcast %18 : vector<8x1xi32> to vector<8x128xi32>
    %20 = arith.cmpi eq, %19, %4 : vector<8x128xi32>
    %21 = arith.extui %20 : vector<8x128xi1> to vector<8x128xi32>
    %22 = arith.sitofp %21 : vector<8x128xi32> to vector<8x128xf32>
    %23 = arith.addf %17, %22 : vector<8x128xf32>
    %24 = vector.extract_strided_slice %3 {offsets = [0, 3], sizes = [8, 1], strides = [1, 1]} : vector<8x8xi32> to vector<8x1xi32>
    %25 = vector.broadcast %24 : vector<8x1xi32> to vector<8x128xi32>
    %26 = arith.cmpi eq, %25, %4 : vector<8x128xi32>
    %27 = arith.extui %26 : vector<8x128xi1> to vector<8x128xi32>
    %28 = arith.sitofp %27 : vector<8x128xi32> to vector<8x128xf32>
    %29 = arith.addf %23, %28 : vector<8x128xf32>
    %30 = vector.extract_strided_slice %3 {offsets = [0, 4], sizes = [8, 1], strides = [1, 1]} : vector<8x8xi32> to vector<8x1xi32>
    %31 = vector.broadcast %30 : vector<8x1xi32> to vector<8x128xi32>
    %32 = arith.cmpi eq, %31, %4 : vector<8x128xi32>
    %33 = arith.extui %32 : vector<8x128xi1> to vector<8x128xi32>
    %34 = arith.sitofp %33 : vector<8x128xi32> to vector<8x128xf32>
    %35 = arith.addf %29, %34 : vector<8x128xf32>
    %36 = vector.extract_strided_slice %3 {offsets = [0, 5], sizes = [8, 1], strides = [1, 1]} : vector<8x8xi32> to vector<8x1xi32>
    %37 = vector.broadcast %36 : vector<8x1xi32> to vector<8x128xi32>
    %38 = arith.cmpi eq, %37, %4 : vector<8x128xi32>
    %39 = arith.extui %38 : vector<8x128xi1> to vector<8x128xi32>
    %40 = arith.sitofp %39 : vector<8x128xi32> to vector<8x128xf32>
    %41 = arith.addf %35, %40 : vector<8x128xf32>
    %42 = vector.extract_strided_slice %3 {offsets = [0, 6], sizes = [8, 1], strides = [1, 1]} : vector<8x8xi32> to vector<8x1xi32>
    %43 = vector.broadcast %42 : vector<8x1xi32> to vector<8x128xi32>
    %44 = arith.cmpi eq, %43, %4 : vector<8x128xi32>
    %45 = arith.extui %44 : vector<8x128xi1> to vector<8x128xi32>
    %46 = arith.sitofp %45 : vector<8x128xi32> to vector<8x128xf32>
    %47 = arith.addf %41, %46 : vector<8x128xf32>
    %48 = vector.extract_strided_slice %3 {offsets = [0, 7], sizes = [8, 1], strides = [1, 1]} : vector<8x8xi32> to vector<8x1xi32>
    %49 = vector.broadcast %48 : vector<8x1xi32> to vector<8x128xi32>
    %50 = arith.cmpi eq, %49, %4 : vector<8x128xi32>
    %51 = arith.extui %50 : vector<8x128xi1> to vector<8x128xi32>
    %52 = arith.sitofp %51 : vector<8x128xi32> to vector<8x128xf32>
    %53 = arith.addf %47, %52 : vector<8x128xf32>
    %c0_2 = arith.constant 0 : index
    %c0_3 = arith.constant 0 : index
    %54 = vector.load %arg12[%c0_2, %c0_3] : memref<8x128xf32, #tpu.memory_space<vmem>>, vector<8x128xf32>
    %55 = arith.truncf %53 : vector<8x128xf32> to vector<8x128xbf16>
    %c0_4 = arith.constant 0 : index
    %c0_5 = arith.constant 0 : index
    %56 = vector.load %arg3[%c0_4, %c0_5] : memref<128x128xbf16, #tpu.memory_space<vmem>>, vector<128x128xbf16>
    %cst_6 = arith.constant dense<0.000000e+00> : vector<8x128xf32>
    %57 = tpu.matmul %55, %56, %cst_6 {dimension_numbers = #tpu.dot_dimension_numbers<[1], [0], [0], [1], [0, 0, 1, 1], [], []>} : vector<8x128xbf16>, vector<128x128xbf16>, vector<8x128xf32> -> vector<8x128xf32>
    %58 = arith.addf %54, %57 : vector<8x128xf32>
    %c0_7 = arith.constant 0 : index
    %c0_8 = arith.constant 0 : index
    %59 = vector.load %arg12[%c0_7, %c0_8] : memref<8x128xf32, #tpu.memory_space<vmem>>, vector<8x128xf32>
    tpu.vector_store %arg12[%c0_7, %c0_8], %58 {strides = array<i32>} : memref<8x128xf32, #tpu.memory_space<vmem>>, vector<8x128xf32>,
    %c0_i32_9 = arith.constant 0 : i32
    %60 = arith.cmpi eq, %arg1, %c0_i32_9 : i32
    %61 = arith.extui %60 : i1 to i32
    %c0_i32_10 = arith.constant 0 : i32
    %62 = arith.cmpi ne, %61, %c0_i32_10 : i32
    scf.if %62 {
      %c0_11 = arith.constant 0 : index
      %c0_12 = arith.constant 0 : index
      %63 = vector.load %arg12[%c0_11, %c0_12] : memref<8x128xf32, #tpu.memory_space<vmem>>, vector<8x128xf32>
      %cst_13 = arith.constant 1.250000e-01 : f32
      %64 = vector.broadcast %cst_13 : f32 to vector<8x128xf32>
      %65 = arith.mulf %63, %64 : vector<8x128xf32>
      %c0_14 = arith.constant 0 : index
      %c0_15 = arith.constant 0 : index
      %66 = vector.load %arg11[%c0_14, %c0_15] : memref<8x128xf32, #tpu.memory_space<vmem>>, vector<8x128xf32>
      tpu.vector_store %arg11[%c0_14, %c0_15], %65 {strides = array<i32>} : memref<8x128xf32, #tpu.memory_space<vmem>>, vector<8x128xf32>,
      %67 = arith.truncf %65 : vector<8x128xf32> to vector<8x128xbf16>
      %c0_16 = arith.constant 0 : index
      %c0_17 = arith.constant 0 : index
      %68 = vector.load %arg4[%c0_16, %c0_17] : memref<128x128xbf16, #tpu.memory_space<vmem>>, vector<128x128xbf16>
      %cst_18 = arith.constant dense<0.000000e+00> : vector<8x128xf32>
      %69 = tpu.matmul %67, %68, %cst_18 {dimension_numbers = #tpu.dot_dimension_numbers<[1], [0], [0], [1], [0, 0, 1, 1], [], []>} : vector<8x128xbf16>, vector<128x128xbf16>, vector<8x128xf32> -> vector<8x128xf32>
      %c0_19 = arith.constant 0 : index
      %c0_20 = arith.constant 0 : index
      %70 = vector.load %arg5[%c0_19, %c0_20] : memref<1x128xf32, #tpu.memory_space<vmem>>, vector<1x128xf32>
      %71 = vector.broadcast %70 : vector<1x128xf32> to vector<8x128xf32>
      %72 = arith.addf %69, %71 : vector<8x128xf32>
      %cst_21 = arith.constant 0.000000e+00 : f32
      %73 = vector.broadcast %cst_21 : f32 to vector<8x128xf32>
      %74 = arith.maximumf %72, %73 : vector<8x128xf32>
      %75 = arith.truncf %74 : vector<8x128xf32> to vector<8x128xbf16>
      %c0_22 = arith.constant 0 : index
      %c0_23 = arith.constant 0 : index
      %76 = vector.load %arg6[%c0_22, %c0_23] : memref<128x128xbf16, #tpu.memory_space<vmem>>, vector<128x128xbf16>
      %cst_24 = arith.constant dense<0.000000e+00> : vector<8x128xf32>
      %77 = tpu.matmul %75, %76, %cst_24 {dimension_numbers = #tpu.dot_dimension_numbers<[1], [0], [0], [1], [0, 0, 1, 1], [], []>} : vector<8x128xbf16>, vector<128x128xbf16>, vector<8x128xf32> -> vector<8x128xf32>
      %c0_25 = arith.constant 0 : index
      %c0_26 = arith.constant 0 : index
      %78 = vector.load %arg7[%c0_25, %c0_26] : memref<1x128xf32, #tpu.memory_space<vmem>>, vector<1x128xf32>
      %79 = vector.broadcast %78 : vector<1x128xf32> to vector<8x128xf32>
      %80 = arith.addf %77, %79 : vector<8x128xf32>
      %cst_27 = arith.constant 0.000000e+00 : f32
      %81 = vector.broadcast %cst_27 : f32 to vector<8x128xf32>
      %82 = arith.maximumf %80, %81 : vector<8x128xf32>
      %83 = arith.truncf %82 : vector<8x128xf32> to vector<8x128xbf16>
      %c0_28 = arith.constant 0 : index
      %c0_29 = arith.constant 0 : index
      %84 = vector.load %arg8[%c0_28, %c0_29] : memref<128x128xbf16, #tpu.memory_space<vmem>>, vector<128x128xbf16>
      %cst_30 = arith.constant dense<0.000000e+00> : vector<8x128xf32>
      %85 = tpu.matmul %83, %84, %cst_30 {dimension_numbers = #tpu.dot_dimension_numbers<[1], [0], [0], [1], [0, 0, 1, 1], [], []>} : vector<8x128xbf16>, vector<128x128xbf16>, vector<8x128xf32> -> vector<8x128xf32>
      %c0_31 = arith.constant 0 : index
      %c0_32 = arith.constant 0 : index
      %86 = vector.load %arg9[%c0_31, %c0_32] : memref<1x128xf32, #tpu.memory_space<vmem>>, vector<1x128xf32>
      %87 = vector.broadcast %86 : vector<1x128xf32> to vector<8x128xf32>
      %88 = arith.addf %85, %87 : vector<8x128xf32>
      %c0_33 = arith.constant 0 : index
      %c0_34 = arith.constant 0 : index
      %89 = vector.load %arg10[%c0_33, %c0_34] : memref<8x128xf32, #tpu.memory_space<vmem>>, vector<8x128xf32>
      tpu.vector_store %arg10[%c0_33, %c0_34], %88 {strides = array<i32>} : memref<8x128xf32, #tpu.memory_space<vmem>>, vector<8x128xf32>,
    } else {
    }
    return
  }
  func.func @transform_0(%arg0: i32, %arg1: i32) -> (i32, i32) {
    %c0_i32 = arith.constant 0 : i32
    return %arg0, %arg1 : i32, i32
  }
  func.func @transform_1(%arg0: i32, %arg1: i32) -> (i32, i32) {
    %c0_i32 = arith.constant 0 : i32
    %c0_i32_0 = arith.constant 0 : i32
    %c0_i32_1 = arith.constant 0 : i32
    return %c0_i32, %c0_i32_0 : i32, i32
  }
  func.func @transform_2(%arg0: i32, %arg1: i32) -> (i32, i32) {
    %c0_i32 = arith.constant 0 : i32
    %c0_i32_0 = arith.constant 0 : i32
    %c0_i32_1 = arith.constant 0 : i32
    return %c0_i32, %c0_i32_0 : i32, i32
  }
  func.func @transform_3(%arg0: i32, %arg1: i32) -> (i32, i32) {
    %c0_i32 = arith.constant 0 : i32
    %c0_i32_0 = arith.constant 0 : i32
    %c0_i32_1 = arith.constant 0 : i32
    return %c0_i32, %c0_i32_0 : i32, i32
  }
  func.func @transform_4(%arg0: i32, %arg1: i32) -> (i32, i32) {
    %c0_i32 = arith.constant 0 : i32
    %c0_i32_0 = arith.constant 0 : i32
    %c0_i32_1 = arith.constant 0 : i32
    return %c0_i32, %c0_i32_0 : i32, i32
  }
  func.func @transform_5(%arg0: i32, %arg1: i32) -> (i32, i32) {
    %c0_i32 = arith.constant 0 : i32
    %c0_i32_0 = arith.constant 0 : i32
    %c0_i32_1 = arith.constant 0 : i32
    return %c0_i32, %c0_i32_0 : i32, i32
  }
  func.func @transform_6(%arg0: i32, %arg1: i32) -> (i32, i32) {
    %c0_i32 = arith.constant 0 : i32
    %c0_i32_0 = arith.constant 0 : i32
    %c0_i32_1 = arith.constant 0 : i32
    return %c0_i32, %c0_i32_0 : i32, i32
  }
  func.func @transform_7(%arg0: i32, %arg1: i32) -> (i32, i32) {
    %c0_i32 = arith.constant 0 : i32
    %c0_i32_0 = arith.constant 0 : i32
    %c0_i32_1 = arith.constant 0 : i32
    return %c0_i32, %c0_i32_0 : i32, i32
  }
  func.func @transform_8(%arg0: i32, %arg1: i32) -> (i32, i32) {
    %c0_i32 = arith.constant 0 : i32
    %c0_i32_0 = arith.constant 0 : i32
    return %arg0, %c0_i32 : i32, i32
  }
  func.func @transform_9(%arg0: i32, %arg1: i32) -> (i32, i32) {
    %c0_i32 = arith.constant 0 : i32
    %c0_i32_0 = arith.constant 0 : i32
    return %arg0, %c0_i32 : i32, i32
  }
}

</mosaic_0001>

<bundles_post_ra>
// kernel: tpu_custom_call.1
= control target key start
LH: loop header
LB: loop body
LE: loop exit
PB: predicated region body
PF: predicated region fallthrough
CT: control target
= control target key end

     0   :  { %15 = vsyncpa [#allocation4], 0  ;;  %s1253_s0 = inlined_call_operand.hbm [shape: s32[8,8], index: 0, kind: input, shape index: {}]   ;;  %s1254_s1 = inlined_call_operand.hbm [shape: bf16[128,128], index: 1, kind: input, shape index: {}]   ;;  %s1255_s2 = inlined_call_operand.hbm [shape: bf16[128,128], index: 2, kind: input, shape index: {}]   ;;  %s1256_s3 = inlined_call_operand.vmem [shape: f32[1,128], index: 3, kind: input, shape index: {}]   ;;  %s1257_s4 = inlined_call_operand.hbm [shape: bf16[128,128], index: 4, kind: input, shape index: {}]   ;;  %s1258_s5 = inlined_call_operand.vmem [shape: f32[1,128], index: 5, kind: input, shape index: {}]   ;;  %s1259_s6 = inlined_call_operand.hbm [shape: bf16[128,128], index: 6, kind: input, shape index: {}]   ;;  %s1260_s7 = inlined_call_operand.vmem [shape: f32[1,128], index: 7, kind: input, shape index: {}]   ;;  %s1261_s8 = inlined_call_operand.hbm [shape: f32[8,128], index: 8, kind: output, shape index: {0}]   ;;  %s1262_s9 = inlined_call_operand.hbm [shape: f32[8,128], index: 9, kind: output, shape index: {1}]  }
   0x1   :  { %16 = vsyncpa [#allocation7], 0 }
   0x2   :  { %17 = vsyncpa [#allocation10], 0 }
   0x3   :  { %18 = vsyncpa [#allocation5], 0 }
   0x4   :  { %19 = vsyncpa [#allocation14], 0  ;;  %s1031_s30 = smov [#allocation6]   ;;  %s867_s13 = scalar_lea.hbm %s1254_s1, 1024 }
   0x5   :  { %s35_s10 = sshll.u32 %s1031_s30, 4  ;;  %p868_p0 = scmp.ne.s32.totalorder %s1254_s1, %s867_s13  ;;  %s36_s10 = int_to_ptr.vmem [resolvable:$true] %s35_s10 }
   0x6   :  { %p871_p1 = scmp.lt.u32.totalorder %s867_s13, %s1254_s1 }
   0x8   :  { %p873_p2 = pnand %p871_p1, %p868_p0 }
   0xa   :  { %876 = shalt.err (!%p873_p2)
}
   0xb   :  { %s877_s18 = scalar_lea.vmem %s36_s10, 1024  ;;  %p882_p4 = scmp.lt.s32.totalorder %s36_s10, %s36_s10 }
   0xc   :  { %p878_p3 = scmp.ne.s32.totalorder %s36_s10, %s877_s18  ;;  %p883_p5 = scmp.lt.s32.totalorder %s877_s18, %s877_s18 }
   0xe   :  { %p884_p6 = por %p883_p5, %p882_p4 }
  0x10   :  { %p885_p7 = pnand %p884_p6, %p878_p3 }
  0x12   :  { %888 = shalt.err (!%p885_p7)
}
  0x13   :  { %s1032_s19 = smov 64   ;;  %s1033_s20 = smov 4  }
  0x14   :  { %41 = dma.hbm_to_vmem [thread:$0]  %s1254_s1, 1024, %s36_s10, [#allocation7], %s1032_s19, %s1032_s19, %s1033_s20  }
  0x15   :  { %s1034_s23 = smov [#allocation9]   ;;  %s1035_s25 = smov [#allocation3]  }
  0x16   :  { %s61_s24 = sshll.u32 %s1034_s23, 4  ;;  %s26_s26 = sshll.u32 %s1035_s25, 4  ;;  %s62_s24 = int_to_ptr.vmem [resolvable:$true] %s61_s24  ;;  %s27_s26 = int_to_ptr.vmem [resolvable:$true] %s26_s26 }
  0x17   :  { %s889_s29 = scalar_lea.hbm %s1257_s4, 1024 }
  0x18   :  { %p890_p8 = scmp.ne.s32.totalorder %s1257_s4, %s889_s29  ;;  %p893_p9 = scmp.lt.u32.totalorder %s889_s29, %s1257_s4 }
  0x1a   :  { %p895_p10 = pnand %p893_p9, %p890_p8 }
  0x1c   :  { %898 = shalt.err (!%p895_p10)
}
  0x1d   :  { %s899_s1 = scalar_lea.vmem %s62_s24, 1024  ;;  %p904_p12 = scmp.lt.s32.totalorder %s62_s24, %s62_s24 }
  0x1e   :  { %p900_p11 = scmp.ne.s32.totalorder %s62_s24, %s899_s1  ;;  %p905_p13 = scmp.lt.s32.totalorder %s899_s1, %s899_s1 }
  0x20   :  { %p906_p0 = por %p905_p13, %p904_p12 }
  0x22   :  { %p907_p1 = pnand %p906_p0, %p900_p11 }
  0x24   :  { %910 = shalt.err (!%p907_p1)
}
  0x25   :  { %67 = dma.hbm_to_vmem [thread:$0]  %s1257_s4, 1024, %s62_s24, [#allocation10], %s1032_s19, %s1032_s19, %s1033_s20  }
  0x26   :  { %s911_s17 = scalar_lea.hbm %s1253_s0, 128 }
  0x27   :  { %p912_p2 = scmp.ne.s32.totalorder %s1253_s0, %s911_s17  ;;  %p915_p3 = scmp.lt.u32.totalorder %s911_s17, %s1253_s0 }
  0x29   :  { %p917_p4 = pnand %p915_p3, %p912_p2 }
  0x2b   :  { %920 = shalt.err (!%p917_p4)
}
  0x2c   :  { %s921_s25 = scalar_lea.vmem %s27_s26, 128  ;;  %p926_p6 = scmp.lt.s32.totalorder %s27_s26, %s27_s26 }
  0x2d   :  { %p922_p5 = scmp.ne.s32.totalorder %s27_s26, %s921_s25  ;;  %p927_p7 = scmp.lt.s32.totalorder %s921_s25, %s921_s25 }
  0x2f   :  { %p928_p8 = por %p927_p7, %p926_p6 }
  0x31   :  { %p929_p9 = pnand %p928_p8, %p922_p5 }
  0x33   :  { %932 = shalt.err (!%p929_p9)
}
  0x34   :  { %29 = dma.hbm_to_vmem [thread:$0]  %s1253_s0, 128, %s27_s26, [#allocation4]  }
  0x35   :  { %s1036_s27 = smov [#allocation8]   ;;  %s1037_s29 = smov [#allocation11]  }
  0x36   :  { %s47_s28 = sshll.u32 %s1036_s27, 4  ;;  %s75_s30 = sshll.u32 %s1037_s29, 4  ;;  %s48_s28 = int_to_ptr.vmem [resolvable:$true] %s47_s28  ;;  %s76_s30 = int_to_ptr.vmem [resolvable:$true] %s75_s30 }
  0x37   :  { %s933_s13 = scalar_lea.hbm %s1255_s2, 1024 }
  0x38   :  { %p934_p10 = scmp.ne.s32.totalorder %s1255_s2, %s933_s13  ;;  %p937_p11 = scmp.lt.u32.totalorder %s933_s13, %s1255_s2 }
  0x3a   :  { %p939_p12 = pnand %p937_p11, %p934_p10 }
  0x3c   :  { %942 = shalt.err (!%p939_p12)
}
  0x3d   :  { %s943_s0 = scalar_lea.vmem %s48_s28, 1024  ;;  %p948_p0 = scmp.lt.s32.totalorder %s48_s28, %s48_s28 }
  0x3e   :  { %p944_p13 = scmp.ne.s32.totalorder %s48_s28, %s943_s0  ;;  %p949_p1 = scmp.lt.s32.totalorder %s943_s0, %s943_s0 }
  0x40   :  { %p950_p2 = por %p949_p1, %p948_p0 }
  0x42   :  { %p951_p3 = pnand %p950_p2, %p944_p13 }
  0x44   :  { %954 = shalt.err (!%p951_p3)
}
  0x45   :  { %53 = dma.hbm_to_vmem [thread:$0]  %s1255_s2, 1024, %s48_s28, [#allocation7], %s1032_s19, %s1032_s19, %s1033_s20  }
  0x46   :  { %s955_s21 = scalar_lea.hbm %s1259_s6, 1024 }
  0x47   :  { %p956_p4 = scmp.ne.s32.totalorder %s1259_s6, %s955_s21  ;;  %p959_p5 = scmp.lt.u32.totalorder %s955_s21, %s1259_s6 }
  0x49   :  { %p961_p6 = pnand %p959_p5, %p956_p4 }
  0x4b   :  { %964 = shalt.err (!%p961_p6)
}
  0x4c   :  { %s965_s24 = scalar_lea.vmem %s76_s30, 1024  ;;  %p970_p8 = scmp.lt.s32.totalorder %s76_s30, %s76_s30 }
  0x4d   :  { %p966_p7 = scmp.ne.s32.totalorder %s76_s30, %s965_s24  ;;  %p971_p9 = scmp.lt.s32.totalorder %s965_s24, %s965_s24 }
  0x4f   :  { %p972_p10 = por %p971_p9, %p970_p8 }
  0x51   :  { %p973_p11 = pnand %p972_p10, %p966_p7 }
  0x53   :  { %976 = shalt.err (!%p973_p11)
}
  0x54   :  { %81 = dma.hbm_to_vmem [thread:$0]  %s1259_s6, 1024, %s76_s30, [#allocation10], %s1032_s19, %s1032_s19, %s1033_s20  }
  0x55   :  { %1021 = dma.done.wait [#allocation4], 128  }
  0x56   :  { %1022 = vsyncadd [#allocation4], 4294967168 }
  0x57   :  { %1023 = dma.done.wait [#allocation7], 2048  }
  0x58   :  { %1024 = vsyncadd [#allocation7], 4294965248 }
  0x59   :  { %1025 = dma.done.wait [#allocation10], 2048  }
  0x5a   :  { %1026 = vsyncadd [#allocation10], 4294965248  ;;  %v1038_v0 = vmov 2   ;;  %v1039_v1 = vmov 0   ;;  %v1040_v2 = vmov 0.0   ;;  %v105_v3 = vld [vmem:[#allocation3] sm:$0xff]  ;;  %v106_v25 = vlaneseq }
  0x5b   :  { %828 = vset.pattern.permute.xlu1 %v1038_v0  ;;  %826 = vset.pattern.permute.xlu0 %v1039_v1  ;;  %v835_v4 = vld [vmem:[#allocation6] sm:$0xff]   ;;  %v836_v5 = vld [vmem:[#allocation6 + $0x8] sm:$0xff]   ;;  %v1041_v6 = vmov 3   ;;  %v1042_v7 = vmov 1   ;;  %v837_v8 = vld [vmem:[#allocation6 + $0x10] sm:$0xff]   ;;  %v1043_v9 = vmov 4  }
  0x5c   :  { %727 = vmatprep.subr.bf16.mxu0 %v1040_v2  ;;  %747 = vmatprep.subr.bf16.mxu1 %v1040_v2  ;;  %v1044_v10 = vmov 5   ;;  %v838_v11 = vld [vmem:[#allocation6 + $0x18] sm:$0xff]   ;;  %v839_v12 = vld [vmem:[#allocation6 + $0x20] sm:$0xff]   ;;  %v1045_v13 = vmov 6   ;;  %v1046_v14 = vmov 7   ;;  %v840_v15 = vld [vmem:[#allocation6 + $0x28] sm:$0xff]  }
  0x5d   :  { %123 = vperm.xlu1 %828, %v105_v3   ;;  %109 = vperm.xlu0 %826, %v105_v3   ;;  %v841_v16 = vld [vmem:[#allocation6 + $0x30] sm:$0xff]   ;;  %vm1047_vm0 = vmmov 0   ;;  %v843_v17 = vld [vmem:[#allocation8] sm:$0xff]   ;;  %v842_v18 = vld [vmem:[#allocation6 + $0x38] sm:$0xff]   ;;  %v107_v28 = vand.u32 127, %v106_v25 }
  0x5e   :  { %728 = vmatpush3.bf16.msra.mxu0 %v835_v4  ;;  %743 = vmatprep.mubr.msk.bf16.mxu0 %vm1047_vm0, %v1040_v2  ;;  %v844_v19 = vld [vmem:[#allocation8 + $0x8] sm:$0xff]   ;;  %v845_v20 = vld [vmem:[#allocation8 + $0x10] sm:$0xff]   ;;  %v846_v21 = vld [vmem:[#allocation8 + $0x18] sm:$0xff]  }
  0x5f   :  { %729 = vmatprep.subr.bf16.mxu0 %v1040_v2  ;;  %763 = vmatprep.mubr.msk.bf16.mxu1 %vm1047_vm0, %v1040_v2  ;;  %v847_v22 = vld [vmem:[#allocation8 + $0x20] sm:$0xff]   ;;  %v848_v23 = vld [vmem:[#allocation8 + $0x28] sm:$0xff]   ;;  %v849_v24 = vld [vmem:[#allocation8 + $0x30] sm:$0xff]  }
  0x60   :  { %748 = vmatpush3.bf16.msra.mxu1 %v843_v17  ;;  %v850_v51 = vld [vmem:[#allocation8 + $0x38] sm:$0xff]   ;;  %v851_v52 = vld [vmem:[#allocation9] sm:$0xff]   ;;  %v852_v53 = vld [vmem:[#allocation9 + $0x8] sm:$0xff]  }
  0x61   :  { %829 = vset.pattern.permute.xlu1 %v1041_v6  ;;  %827 = vset.pattern.permute.xlu0 %v1042_v7  ;;  %v853_v54 = vld [vmem:[#allocation9 + $0x10] sm:$0xff]   ;;  %v854_v55 = vld [vmem:[#allocation9 + $0x18] sm:$0xff]   ;;  %v855_v56 = vld [vmem:[#allocation9 + $0x20] sm:$0xff]  }
  0x62   :  { %130 = vperm.xlu1 %829, %v105_v3   ;;  %116 = vperm.xlu0 %827, %v105_v3   ;;  %v856_v57 = vld [vmem:[#allocation9 + $0x28] sm:$0xff]   ;;  %v857_v0 = vld [vmem:[#allocation9 + $0x30] sm:$0xff]   ;;  %v858_v1 = vld [vmem:[#allocation9 + $0x38] sm:$0xff]  }
  0x63   :  { %730 = vmatpush3.bf16.msra.mxu0 %v836_v5  ;;  %749 = vmatprep.subr.bf16.mxu1 %v1040_v2  ;;  %v860_v4 = vld [vmem:[#allocation11 + $0x8] sm:$0xff]   ;;  %v861_v5 = vld [vmem:[#allocation11 + $0x10] sm:$0xff]   ;;  %v862_v6 = vld [vmem:[#allocation11 + $0x18] sm:$0xff]  }
  0x64   :  { %731 = vmatprep.subr.bf16.mxu0 %v1040_v2  ;;  %750 = vmatpush3.bf16.msra.mxu1 %v844_v19  ;;  %v863_v7 = vld [vmem:[#allocation11 + $0x20] sm:$0xff]   ;;  %v865_v17 = vld [vmem:[#allocation11 + $0x30] sm:$0xff]   ;;  %v673_v19 = vld [vmem:[%s1258_s5] ss:$0 sm:$0xff] }
  0x65   :  { %751 = vmatprep.subr.bf16.mxu1 %v1040_v2 }
  0x66   :  { %830 = vset.pattern.permute.xlu1 %v1043_v9  ;;  %831 = vset.pattern.permute.xlu0 %v1044_v10  ;;  %v664_v9 = vld [vmem:[%s1256_s3] ss:$0 sm:$0xff]  ;;  %s1048_s3 = smov [#allocation13]  }
  0x67   :  { %137 = vperm.xlu1 %830, %v105_v3   ;;  %144 = vperm.xlu0 %831, %v105_v3   ;;  %s633_s29 = sshll.u32 %s1048_s3, 4  ;;  %s634_s29 = int_to_ptr.vmem [resolvable:$true] %s633_s29 }
  0x68   :  { %732 = vmatpush3.bf16.msra.mxu0 %v837_v8  ;;  %752 = vmatpush3.bf16.msra.mxu1 %v845_v20  ;;  %v864_v8 = vld [vmem:[#allocation11 + $0x28] sm:$0xff]   ;;  %s977_s30 = scalar_lea.vmem %s634_s29, 128  ;;  %p982_p13 = scmp.lt.s32.totalorder %s634_s29, %s634_s29 }
  0x69   :  { %733 = vmatprep.subr.bf16.mxu0 %v1040_v2  ;;  %753 = vmatprep.subr.bf16.mxu1 %v1040_v2  ;;  %p978_p12 = scmp.ne.s32.totalorder %s634_s29, %s977_s30  ;;  %p983_p0 = scmp.lt.s32.totalorder %s977_s30, %s977_s30 }
  0x6b   :  { %832 = vset.pattern.permute.xlu1 %v1045_v13  ;;  %834 = vset.pattern.permute.xlu0 %v1046_v14  ;;  %p984_p1 = por %p983_p0, %p982_p13 }
  0x6c   :  { %151 = vperm.xlu1 %832, %v105_v3   ;;  %734 = vmatpush3.bf16.msra.mxu0 %v838_v11 }
  0x6d   :  { %735 = vmatprep.subr.bf16.mxu0 %v1040_v2  ;;  %754 = vmatpush3.bf16.msra.mxu1 %v846_v21  ;;  %p985_p2 = pnand %p984_p1, %p978_p12 }
  0x6e   :  { %755 = vmatprep.subr.bf16.mxu1 %v1040_v2 }
  0x70   :  { %833 = vset.pattern.permute.xlu1 %v1046_v14  ;;  %736 = vmatpush3.bf16.msra.mxu0 %v839_v12 }
  0x71   :  { %158 = vperm.xlu1 %833, %v105_v3   ;;  %737 = vmatprep.subr.bf16.mxu0 %v1040_v2  ;;  %v859_v3 = vld [vmem:[#allocation11] sm:$0xff]  }
  0x72   :  { %756 = vmatpush3.bf16.msra.mxu1 %v847_v22 }
  0x73   :  { %757 = vmatprep.subr.bf16.mxu1 %v1040_v2 }
  0x74   :  { %738 = vmatpush3.bf16.msra.mxu0 %v840_v15 }
  0x75   :  { %739 = vmatprep.subr.bf16.mxu0 %v1040_v2 }
  0x76   :  { %758 = vmatpush3.bf16.msra.mxu1 %v848_v23 }
  0x77   :  { %759 = vmatprep.subr.bf16.mxu1 %v1040_v2 }
  0x78   :  { %740 = vmatpush3.bf16.msra.mxu0 %v841_v16 }
  0x79   :  { %741 = vmatprep.subr.bf16.mxu0 %v1040_v2 }
  0x7a   :  { %760 = vmatpush3.bf16.msra.mxu1 %v849_v24 }
  0x7b   :  { %761 = vmatprep.subr.bf16.mxu1 %v1040_v2 }
  0x7c   :  { %742 = vmatpush3.bf16.msra.mxu0 %v842_v18  ;;  %v866_v18 = vld [vmem:[#allocation11 + $0x38] sm:$0xff]  }
  0x7d   :  { %767 = vmatprep.subr.bf16.mxu0 %v1040_v2 }
  0x7e   :  { %762 = vmatpush3.bf16.msra.mxu1 %v850_v51 }
  0x7f   :  { %787 = vmatprep.subr.bf16.mxu1 %v1040_v2 }
  0xdc   :  { %v124_v26 = vpop.permute.xlu1 %123  ;;  %v110_v27 = vpop.permute.xlu0 %109 }
  0xdd   :  { %vm111_vm1 = vcmp.eq.s32.totalorder %v110_v27, %v107_v28  ;;  %vm125_vm2 = vcmp.eq.s32.totalorder %v124_v26, %v107_v28 }
  0xde   :  { %v648_v31 = vsel %vm111_vm1, 1.0, %v1040_v2  ;;  %v650_v34 = vsel %vm125_vm2, 1.0, %v1040_v2 }
  0xe1   :  { %v131_v29 = vpop.permute.xlu1 %130  ;;  %v117_v30 = vpop.permute.xlu0 %116 }
  0xe2   :  { %vm118_vm3 = vcmp.eq.s32.totalorder %v117_v30, %v107_v28  ;;  %vm132_vm4 = vcmp.eq.s32.totalorder %v131_v29, %v107_v28 }
  0xe3   :  { %v649_v32 = vsel %vm118_vm3, 1.0, %v1040_v2  ;;  %v651_v38 = vsel %vm132_vm4, 1.0, %v1040_v2 }
  0xe4   :  { %v121_v33 = vadd.f32 %v649_v32, %v648_v31 }
  0xe6   :  { %v128_v35 = vadd.f32 %v650_v34, %v121_v33  ;;  %v138_v36 = vpop.permute.xlu1 %137  ;;  %v145_v37 = vpop.permute.xlu0 %144 }
  0xe7   :  { %vm139_vm5 = vcmp.eq.s32.totalorder %v138_v36, %v107_v28  ;;  %vm146_vm6 = vcmp.eq.s32.totalorder %v145_v37, %v107_v28 }
  0xe8   :  { %v135_v39 = vadd.f32 %v651_v38, %v128_v35  ;;  %v652_v40 = vsel %vm139_vm5, 1.0, %v1040_v2  ;;  %v653_v42 = vsel %vm146_vm6, 1.0, %v1040_v2 }
  0xea   :  { %v142_v41 = vadd.f32 %v652_v40, %v135_v39 }
  0xeb   :  { %v152_v43 = vpop.permute.xlu1 %151 }
  0xec   :  { %vm153_vm7 = vcmp.eq.s32.totalorder %v152_v43, %v107_v28  ;;  %v149_v44 = vadd.f32 %v653_v42, %v142_v41 }
  0xed   :  { %v654_v45 = vsel %vm153_vm7, 1.0, %v1040_v2 }
  0xee   :  { %v156_v47 = vadd.f32 %v654_v45, %v149_v44 }
  0xf0   :  { %v159_v46 = vpop.permute.xlu1 %158 }
  0xf1   :  { %vm160_vm8 = vcmp.eq.s32.totalorder %v159_v46, %v107_v28 }
  0xf2   :  { %v655_v48 = vsel %vm160_vm8, 1.0, %v1040_v2 }
  0xf3   :  { %v163_v49 = vadd.f32 %v655_v48, %v156_v47 }
  0xf5   :  { %v165_v50 = vpack.c.bf16 %v163_v49, %v163_v49 }
  0xf7   :  { %744 = vmatmul.mubr.bf16.vlgmr.msra.gmra.mrb[0].mxu0 %v165_v50 }
  0xf8   :  { %783 = vmatprep.mubr.msk.bf16.mxu0 %vm1047_vm0, %v1040_v2  ;;  %768 = vmatpush3.bf16.msra.mxu0 %v851_v52 }
  0xf9   :  { %769 = vmatprep.subr.bf16.mxu0 %v1040_v2 }
  0xfc   :  { %770 = vmatpush3.bf16.msra.mxu0 %v852_v53 }
  0xfd   :  { %771 = vmatprep.subr.bf16.mxu0 %v1040_v2 }
 0x100   :  { %772 = vmatpush3.bf16.msra.mxu0 %v853_v54 }
 0x101   :  { %773 = vmatprep.subr.bf16.mxu0 %v1040_v2 }
 0x104   :  { %774 = vmatpush3.bf16.msra.mxu0 %v854_v55 }
 0x105   :  { %775 = vmatprep.subr.bf16.mxu0 %v1040_v2 }
 0x108   :  { %776 = vmatpush3.bf16.msra.mxu0 %v855_v56 }
 0x109   :  { %777 = vmatprep.subr.bf16.mxu0 %v1040_v2 }
 0x10c   :  { %778 = vmatpush3.bf16.msra.mxu0 %v856_v57 }
 0x10d   :  { %779 = vmatprep.subr.bf16.mxu0 %v1040_v2 }
 0x110   :  { %780 = vmatpush3.bf16.msra.mxu0 %v857_v0 }
 0x111   :  { %781 = vmatprep.subr.bf16.mxu0 %v1040_v2 }
 0x114   :  { %782 = vmatpush3.bf16.msra.mxu0 %v858_v1 }
 0x1ca   :  { %v264_v58 = vpop.f32.mrb[0].mxu0 }
 0x1cb   :  { %v276_v59 = vmul.f32 0.125, %v264_v58  ;;  %v745_v60 = vpop.f32.mrb[1].mxu0 }
 0x1cc   :  { %v267_v61 = vpop.f32.mrb[2].mxu0 }
 0x1cd   :  { %v278_v62 = vpack.c.bf16 %v276_v59, %v276_v59  ;;  %277 = vst [vmem:[#allocation13] sm:$0xff] %v276_v59  ;;  %v746_v63 = vpop.f32.mrb[3].mxu0 }
 0x1cf   :  { %764 = vmatmul.mubr.bf16.vlgmr.msra.gmra.mrb[0].mxu1 %v278_v62 }
 0x1d0   :  { %803 = vmatprep.mubr.msk.bf16.mxu1 %vm1047_vm0, %v1040_v2  ;;  %788 = vmatpush3.bf16.msra.mxu1 %v859_v3 }
 0x1d1   :  { %789 = vmatprep.subr.bf16.mxu1 %v1040_v2 }
 0x1d4   :  { %790 = vmatpush3.bf16.msra.mxu1 %v860_v4 }
 0x1d5   :  { %791 = vmatprep.subr.bf16.mxu1 %v1040_v2 }
 0x1d8   :  { %792 = vmatpush3.bf16.msra.mxu1 %v861_v5 }
 0x1d9   :  { %793 = vmatprep.subr.bf16.mxu1 %v1040_v2 }
 0x1dc   :  { %794 = vmatpush3.bf16.msra.mxu1 %v862_v6 }
 0x1dd   :  { %795 = vmatprep.subr.bf16.mxu1 %v1040_v2 }
 0x1e0   :  { %796 = vmatpush3.bf16.msra.mxu1 %v863_v7 }
 0x1e1   :  { %797 = vmatprep.subr.bf16.mxu1 %v1040_v2 }
 0x1e4   :  { %798 = vmatpush3.bf16.msra.mxu1 %v864_v8 }
 0x1e5   :  { %799 = vmatprep.subr.bf16.mxu1 %v1040_v2 }
 0x1e8   :  { %800 = vmatpush3.bf16.msra.mxu1 %v865_v17 }
 0x1e9   :  { %801 = vmatprep.subr.bf16.mxu1 %v1040_v2 }
 0x1ec   :  { %802 = vmatpush3.bf16.msra.mxu1 %v866_v18 }
 0x2a2   :  { %v384_v10 = vpop.f32.mrb[0].mxu1 }
 0x2a3   :  { %v385_v11 = vadd.f32 %v664_v9, %v384_v10  ;;  %v765_v12 = vpop.f32.mrb[1].mxu1 }
 0x2a4   :  { %v387_v13 = vpop.f32.mrb[2].mxu1 }
 0x2a5   :  { %v390_v14 = vmax.f32 %v385_v11, 0.0  ;;  %v766_v15 = vpop.f32.mrb[3].mxu1 }
 0x2a7   :  { %v391_v16 = vpack.c.bf16 %v390_v14, %v390_v14 }
 0x2a9   :  { %784 = vmatmul.mubr.bf16.vlgmr.msra.gmra.mrb[4].mxu0 %v391_v16 }
 0x37c   :  { %v497_v20 = vpop.f32.mrb[4].mxu0 }
 0x37d   :  { %v498_v21 = vadd.f32 %v673_v19, %v497_v20  ;;  %v785_v22 = vpop.f32.mrb[5].mxu0 }
 0x37e   :  { %v500_v23 = vpop.f32.mrb[6].mxu0 }
 0x37f   :  { %v503_v24 = vmax.f32 %v498_v21, 0.0  ;;  %v786_v25 = vpop.f32.mrb[7].mxu0 }
 0x381   :  { %v504_v26 = vpack.c.bf16 %v503_v24, %v503_v24 }
 0x383   :  { %804 = vmatmul.mubr.bf16.vlgmr.msra.gmra.mrb[4].mxu1 %v504_v26 }
 0x384   :  { %988 = shalt.err (!%p985_p2)
}
 0x385   :  { %s989_s12 = scalar_lea.hbm %s1262_s9, 128 }
 0x386   :  { %p990_p3 = scmp.ne.s32.totalorder %s1262_s9, %s989_s12  ;;  %p993_p4 = scmp.lt.u32.totalorder %s989_s12, %s1262_s9 }
 0x388   :  { %p995_p5 = pnand %p993_p4, %p990_p3 }
 0x38a   :  { %998 = shalt.err (!%p995_p5)
}
 0x38b   :  { %636 = dma.vmem_to_hbm [thread:$0]  %s634_s29, 128, %s1262_s9, [#allocation14]   ;;  %v682_v2 = vld [vmem:[%s1260_s7] ss:$0 sm:$0xff] }
 0x38c   :  { %s1049_s17 = smov [#allocation12]  }
 0x38d   :  { %s623_s18 = sshll.u32 %s1049_s17, 4  ;;  %s624_s18 = int_to_ptr.vmem [resolvable:$true] %s623_s18 }
 0x38e   :  { %s999_s21 = scalar_lea.vmem %s624_s18, 128  ;;  %p1004_p7 = scmp.lt.s32.totalorder %s624_s18, %s624_s18 }
 0x38f   :  { %p1000_p6 = scmp.ne.s32.totalorder %s624_s18, %s999_s21  ;;  %p1005_p8 = scmp.lt.s32.totalorder %s999_s21, %s999_s21 }
 0x391   :  { %p1006_p9 = por %p1005_p8, %p1004_p7 }
 0x393   :  { %p1007_p10 = pnand %p1006_p9, %p1000_p6 }
 0x456   :  { %v610_v27 = vpop.f32.mrb[4].mxu1 }
 0x457   :  { %v611_v28 = vadd.f32 %v682_v2, %v610_v27  ;;  %v805_v29 = vpop.f32.mrb[5].mxu1 }
 0x458   :  { %v613_v30 = vpop.f32.mrb[6].mxu1 }
 0x459   :  { %616 = vst [vmem:[#allocation12] sm:$0xff] %v611_v28  ;;  %v806_v31 = vpop.f32.mrb[7].mxu1 }
 0x45a   :  { %1010 = shalt.err (!%p1007_p10)
}
 0x45b   :  { %s1011_s7 = scalar_lea.hbm %s1261_s8, 128 }
 0x45c   :  { %p1012_p11 = scmp.ne.s32.totalorder %s1261_s8, %s1011_s7  ;;  %p1015_p12 = scmp.lt.u32.totalorder %s1011_s7, %s1261_s8 }
 0x45e   :  { %p1017_p13 = pnand %p1015_p12, %p1012_p11 }
 0x460   :  { %1020 = shalt.err (!%p1017_p13)
}
 0x461   :  { %626 = dma.vmem_to_hbm [thread:$0]  %s624_s18, 128, %s1261_s8, [#allocation5]  }
 0x462   :  { %1027 = dma.done.wait [#allocation5], 128  }
 0x463   :  { %1028 = vsyncadd [#allocation5], 4294967168 }
 0x464   :  { %1029 = dma.done.wait [#allocation14], 128  }
 0x465   :  { %1030 = vsyncadd [#allocation14], 4294967168 }
 0x466   :  { %643 = vsyncpa [#allocation4], 1 }
 0x467   :  { %644 = vsyncpa [#allocation7], 1 }
 0x468   :  { %645 = vsyncpa [#allocation10], 1 }
 0x469   :  { %646 = vsyncpa [#allocation5], 1 }
 0x46a   :  { %647 = vsyncpa [#allocation14], 1 }

</bundles_post_ra>
